<compile_context>
chip_gen: v6e
topology: v6e:2x2x1
jax: 0.10.0
libtpu: 0.0.40
codegen_flags: <defaults>
</compile_context>

<pallas_src>
import functools

import jax
import jax.numpy as jnp
from jax.experimental import pallas as pl
from jax.experimental.pallas import tpu as pltpu


_LANE = 128
_CHUNK_TARGET_BYTES = 512 * 1024          # f32 working-copy budget per compute sub-chunk
_DEFAULT_BLOCK_BUDGET = 8 * 1024 * 1024   # input bytes per (tile_s, D) DMA block
                                          # (v5e/v6e may raise this; v7x is safe at the
                                          #  default because compute temporaries are chunked)


def _round_down(x, m):
    return (x // m) * m


def _sublane_align(itemsize):
    # f32 -> 8 rows, bf16 -> 16 rows, int8/fp8 -> 32 rows (sublane packing).
    return {1: 32, 2: 16}.get(int(itemsize), 8)


def _pick_tiles(seq_len, d_pad, itemsize, block_budget_bytes, tile_s=None):
    """Choose (tile_s, chunk).

    tile_s: rows per HBM->VMEM DMA block (sized by bytes, no row cap).
    chunk : rows per in-kernel compute sub-chunk; divides tile_s, so the f32
            temporaries stay at ~chunk * d_pad * 4 bytes.
    """
    align = _sublane_align(itemsize)
    chunk = max(align, _round_down(_CHUNK_TARGET_BYTES // (d_pad * 4), align))
    if tile_s is None:
        tile = max(chunk, _round_down(block_budget_bytes // (d_pad * itemsize), chunk))
        if tile >= seq_len:
            tile = seq_len            # whole sequence in one (full-dim) block
    else:
        tile = min(int(tile_s), seq_len)
    if tile < seq_len and tile % align != 0:
        raise ValueError(
            f"tile_s={tile} must be a multiple of {align} for itemsize "
            f"{itemsize} (or cover the whole sequence)")
    chunk = min(chunk, tile)
    while tile % chunk != 0:          # largest multiple of `align` dividing tile
        chunk -= align
        if chunk < align:
            chunk = tile
            break
    return tile, chunk


def _tv_kernel(x_ref, o_ref, carry_ref, *, seq_len, tile_s, chunk,
               tiles_per_seg, num_seg, ragged):
    """One (tile_s, D) block of one (batch, segment) pair.

    x_ref:     (tile_s, D) VMEM input block
    o_ref:     (8, D) resident output block (per-sublane/lane partial sums)
    carry_ref: (1, D) f32 scratch holding the previous row
    """
    seg = pl.program_id(1)
    t = pl.program_id(2)
    n_chunks = tile_s // chunk
    tile_row0 = (seg * tiles_per_seg + t) * tile_s   # global row of this block's row 0

    @pl.when(t == 0)
    def _init():
        o_ref[...] = jnp.zeros_like(o_ref)
        # Seed the carry with this tile's own first row: the first chunk's
        # boundary diff is then exactly zero (no mask needed and no NaN risk
        # from uninitialized VMEM).
        carry_ref[...] = x_ref[0:1, :].astype(jnp.float32)

    def chunk_body(c, masked):
        off = c * chunk
        if not isinstance(off, int):
            off = pl.multiple_of(off, chunk)
        xc = x_ref[pl.ds(off, chunk), :].astype(jnp.float32)         # (chunk, D)
        g = tile_row0 + c * chunk                                    # global row of xc[0]

        # Boundary diff: row g vs row g-1 (previous chunk's / tile's last row).
        bd = xc[0:1, :] - carry_ref[...]
        carry_ref[...] = xc[chunk - 1:chunk, :]

        if not masked:
            # Interior chunk (entirely inside the real sequence): mask-free.
            # The cyclic roll covers every consecutive pair in the chunk once
            # plus one wrap pair (xc[0], xc[chunk-1]); because everything is
            # squared the result is independent of the roll direction, and the
            # wrap square is removed again by the (1, D) correction below.
            if chunk > 1:
                nxt = pltpu.roll(xc, shift=chunk - 1, axis=0)        # XLU rotate
                dsq = (nxt - xc) ** 2
                if chunk % 8 == 0:
                    # (chunk//8, 8, D) sum over axis 0: pure VPU vreg adds.
                    o_ref[...] += dsq.reshape(chunk // 8, 8, dsq.shape[-1]).sum(axis=0)
                else:
                    o_ref[0:1, :] += jnp.sum(dsq, axis=0, keepdims=True)
                wrap = xc[0:1, :] - xc[chunk - 1:chunk, :]
                corr = bd * bd - wrap * wrap
            else:
                corr = bd * bd
            o_ref[0:1, :] += corr
        else:
            # Ragged tail: rows at global index >= seq_len hold unspecified
            # (possibly non-finite) data, so zero invalid diffs BEFORE squaring.
            if chunk > 1:
                d = xc[1:, :] - xc[:-1, :]                           # (chunk-1, D)
                row = jax.lax.broadcasted_iota(jnp.int32, (chunk - 1, 1), 0)
                d = jnp.where(row + g < seq_len - 1, d, 0.0)
                o_ref[0:1, :] += jnp.sum(d * d, axis=0, keepdims=True)
            bdm = jnp.where(g < seq_len, bd, 0.0)
            o_ref[0:1, :] += bdm * bdm

    def run_chunks(masked):
        if n_chunks == 1:
            chunk_body(0, masked)
        else:
            def body(c, carry):
                chunk_body(c, masked)
                return carry
            jax.lax.fori_loop(0, n_chunks, body, 0)

    if not ragged:
        # No padded rows anywhere: the mask-free path is exact for every tile.
        run_chunks(masked=False)
    else:
        is_last = jnp.logical_and(seg == num_seg - 1, t == tiles_per_seg - 1)

        @pl.when(jnp.logical_not(is_last))
        def _interior():
            run_chunks(masked=False)

        @pl.when(is_last)
        def _tail():
            run_chunks(masked=True)


def l_tv(x, tv_loss_weight=1.0, *, tile_s=None, num_segments=None,
         block_budget_bytes=_DEFAULT_BLOCK_BUDGET, input_buffer_count=None):
    """Pallas TPU implementation of L_TV.forward.  x: (B, S, D)."""
    B, S, D = x.shape
    itemsize = x.dtype.itemsize

    # Lane-dense last dim: pad D up to a multiple of 128 with zeros.  The
    # padded lanes' diffs are identically zero, so the sum is unchanged.
    d_pad = -(-D // _LANE) * _LANE
    x_in = x if d_pad == D else jnp.pad(x, ((0, 0), (0, 0), (0, d_pad - D)))

    tile, chunk = _pick_tiles(S, d_pad, itemsize, block_budget_bytes, tile_s)
    num_t = -(-S // tile)
    ragged = (S % tile) != 0

    # Optional parallel sequence segments: gives the second v7x TensorCore
    # work when B is tiny.  The missing inter-segment boundary diffs are added
    # back in the wrapper below.  (No-op on v5e/v6e; auto only when it divides.)
    if num_segments is None:
        num_seg = 2 if (B == 1 and num_t >= 2 and num_t % 2 == 0) else 1
    else:
        num_seg = int(num_segments)
        if num_seg < 1 or num_t % num_seg != 0:
            num_seg = 1
    tiles_per_seg = num_t // num_seg

    kernel = functools.partial(
        _tv_kernel, seq_len=S, tile_s=tile, chunk=chunk,
        tiles_per_seg=tiles_per_seg, num_seg=num_seg, ragged=ragged)

    in_spec_kwargs = {}
    if input_buffer_count is not None:          # e.g. 3 to sweep on v7x
        in_spec_kwargs["pipeline_mode"] = pl.Buffered(int(input_buffer_count))
    x_spec = pl.BlockSpec(
        (None, tile, d_pad),
        lambda b, s, t: (b, s * tiles_per_seg + t, 0),
        **in_spec_kwargs)

    block_bytes = tile * d_pad * itemsize
    vmem_limit = int(min(96 * 1024 * 1024,
                         max(32 * 1024 * 1024, 2 * block_bytes + 8 * 1024 * 1024)))

    partials = pl.pallas_call(
        kernel,
        out_shape=jax.ShapeDtypeStruct((B, num_seg, 8, d_pad), jnp.float32),
        grid_spec=pltpu.PrefetchScalarGridSpec(
            num_scalar_prefetch=0,
            grid=(B, num_seg, tiles_per_seg),          # carried tile axis last
            in_specs=[x_spec],
            # Same block for every t -> output resident across the tile axis
            # (accumulator); lane-dense (8, D) block per (batch, segment).
            out_specs=pl.BlockSpec((None, None, 8, d_pad),
                                   lambda b, s, t: (b, s, 0, 0)),
            scratch_shapes=[pltpu.VMEM((1, d_pad), jnp.float32)],
        ),
        compiler_params=pltpu.CompilerParams(
            dimension_semantics=("parallel", "parallel", "arbitrary"),
            vmem_limit_bytes=vmem_limit,
        ),
        cost_estimate=pl.CostEstimate(
            flops=3 * B * max(S - 1, 0) * D,
            transcendentals=0,
            bytes_accessed=B * S * d_pad * itemsize + B * num_seg * 8 * d_pad * 4,
        ),
    )(x_in)

    h_tv = jnp.sum(partials)

    # Diffs across segment seams are not visible to any kernel instance; add
    # them here (num_seg - 1 rows per batch element -> a tiny gather).
    if num_seg > 1:
        seg_rows = tiles_per_seg * tile
        bidx = jnp.arange(1, num_seg) * seg_rows
        xa = jnp.take(x, bidx, axis=1).astype(jnp.float32)
        xb = jnp.take(x, bidx - 1, axis=1).astype(jnp.float32)
        h_tv = h_tv + jnp.sum((xa - xb) ** 2)

    # NOTE: S == 1 gives count_h == 0 -> 0/0 == NaN, matching the PyTorch module.
    count_h = jnp.float32((S - 1) * S)
    return (float(tv_loss_weight) * 2.0 / B) * (h_tv / count_h)


def l_tv_ref(x, tv_loss_weight=1.0):
    """Plain-JAX reference mirroring the PyTorch forward."""
    B, S, _ = x.shape
    xf = x.astype(jnp.float32)
    d = xf[:, 1:, :] - xf[:, :-1, :]
    return tv_loss_weight * 2.0 * (jnp.sum(d * d) / ((S - 1) * S)) / B


if __name__ == "__main__":
    key = jax.random.PRNGKey(0)
    k1, k2, k3, k4, k5 = jax.random.split(key, 5)

    def check(name, out, ref, rtol=1e-4, atol=1e-5):
        out = jax.block_until_ready(out)
        ok = jnp.allclose(out, ref, rtol=rtol, atol=atol)
        assert bool(ok), (name, float(out), float(ref))

    # (1) Single tile, D padded 32 -> 128 lanes (batch=2, seq=8, hidden=32).
    x1 = jax.random.normal(k1, (2, 8, 32), dtype=jnp.float32)
    check("single-tile", l_tv(x1), l_tv_ref(x1))

    # (2) Multi-tile with cross-tile carry (3 tiles of 16 rows).
    x2 = jax.random.normal(k2, (2, 48, 128), dtype=jnp.float32)
    check("multi-tile", l_tv(x2, 0.5, tile_s=16), l_tv_ref(x2, 0.5))

    # (3) Ragged last tile (40 rows over 16-row tiles) -> masked tail path.
    x3 = jax.random.normal(k3, (2, 40, 128), dtype=jnp.float32)
    check("ragged", l_tv(x3, tile_s=16), l_tv_ref(x3))

    # (4) B == 1 with two parallel sequence segments (v7x megacore path),
    #     combined with a ragged last tile; the wrapper adds the seam diff.
    x4 = jax.random.normal(k4, (1, 56, 128), dtype=jnp.float32)
    check("segments", l_tv(x4, tile_s=16, num_segments=2), l_tv_ref(x4))

    # (5) bf16 input stays bf16 over HBM, accumulates in f32 inside the kernel.
    x5 = jax.random.normal(k5, (2, 48, 128), dtype=jnp.float32).astype(jnp.bfloat16)
    check("bf16", l_tv(x5, tile_s=16), l_tv_ref(x5), rtol=1e-3, atol=1e-3)

    print("KERNEL_OK")
</pallas_src>

<mosaic_0001>
module attributes {stable_mosaic.version = 11 : i64} {
  func.func @_tv_kernel(%arg0: i32, %arg1: i32, %arg2: i32, %arg3: memref<1x8x128xf32, #tpu.memory_space<vmem>>, %arg4: memref<1x1x8x128xf32, #tpu.memory_space<vmem>>, %arg5: memref<1x128xf32, #tpu.memory_space<vmem>>) attributes {dimension_semantics = [#tpu.dimension_semantics<parallel>, #tpu.dimension_semantics<parallel>, #tpu.dimension_semantics<arbitrary>], iteration_bounds = array<i64: 2, 1, 1>, scalar_prefetch = 0 : i64, scratch_operands = 1 : i64, tpu.core_type = #tpu.core_type<tc>, window_params = [{transform_indices = @transform_0, window_bounds = array<i64: 1, 8, 128>}, {transform_indices = @transform_1, window_bounds = array<i64: 1, 1, 8, 128>}]} {
    %c0_i32 = arith.constant 0 : i32
    %0 = arith.cmpi eq, %arg2, %c0_i32 : i32
    %1 = arith.extui %0 : i1 to i32
    %c0_i32_0 = arith.constant 0 : i32
    %2 = arith.cmpi ne, %1, %c0_i32_0 : i32
    scf.if %2 {
      %cst_23 = arith.constant 0.000000e+00 : f32
      %33 = vector.broadcast %cst_23 : f32 to vector<8x128xf32>
      %c0_24 = arith.constant 0 : index
      %c0_25 = arith.constant 0 : index
      %c0_26 = arith.constant 0 : index
      %c0_27 = arith.constant 0 : index
      %34 = vector.load %arg4[%c0_24, %c0_25, %c0_26, %c0_27] : memref<1x1x8x128xf32, #tpu.memory_space<vmem>>, vector<1x1x8x128xf32>
      %35 = vector.shape_cast %34 : vector<1x1x8x128xf32> to vector<8x128xf32>
      %36 = vector.shape_cast %33 : vector<8x128xf32> to vector<1x1x8x128xf32>
      tpu.vector_store %arg4[%c0_24, %c0_25, %c0_26, %c0_27], %36 {strides = array<i32>} : memref<1x1x8x128xf32, #tpu.memory_space<vmem>>, vector<1x1x8x128xf32>,
      %c0_28 = arith.constant 0 : index
      %c0_29 = arith.constant 0 : index
      %c0_30 = arith.constant 0 : index
      %37 = vector.load %arg3[%c0_28, %c0_29, %c0_30] : memref<1x8x128xf32, #tpu.memory_space<vmem>>, vector<1x1x128xf32>
      %38 = vector.shape_cast %37 : vector<1x1x128xf32> to vector<1x128xf32>
      %c0_31 = arith.constant 0 : index
      %c0_32 = arith.constant 0 : index
      %39 = vector.load %arg5[%c0_31, %c0_32] : memref<1x128xf32, #tpu.memory_space<vmem>>, vector<1x128xf32>
      tpu.vector_store %arg5[%c0_31, %c0_32], %38 {strides = array<i32>} : memref<1x128xf32, #tpu.memory_space<vmem>>, vector<1x128xf32>,
    } else {
    }
    %c0 = arith.constant 0 : index
    %c0_1 = arith.constant 0 : index
    %c0_2 = arith.constant 0 : index
    %3 = vector.load %arg3[%c0, %c0_1, %c0_2] : memref<1x8x128xf32, #tpu.memory_space<vmem>>, vector<1x8x128xf32>
    %4 = vector.shape_cast %3 : vector<1x8x128xf32> to vector<8x128xf32>
    %5 = vector.extract_strided_slice %4 {offsets = [0, 0], sizes = [1, 128], strides = [1, 1]} : vector<8x128xf32> to vector<1x128xf32>
    %c0_3 = arith.constant 0 : index
    %c0_4 = arith.constant 0 : index
    %6 = vector.load %arg5[%c0_3, %c0_4] : memref<1x128xf32, #tpu.memory_space<vmem>>, vector<1x128xf32>
    %7 = arith.subf %5, %6 : vector<1x128xf32>
    %8 = vector.extract_strided_slice %4 {offsets = [7, 0], sizes = [1, 128], strides = [1, 1]} : vector<8x128xf32> to vector<1x128xf32>
    %c0_5 = arith.constant 0 : index
    %c0_6 = arith.constant 0 : index
    %9 = vector.load %arg5[%c0_5, %c0_6] : memref<1x128xf32, #tpu.memory_space<vmem>>, vector<1x128xf32>
    tpu.vector_store %arg5[%c0_5, %c0_6], %8 {strides = array<i32>} : memref<1x128xf32, #tpu.memory_space<vmem>>, vector<1x128xf32>,
    %c7_i32 = arith.constant 7 : i32
    %10 = tpu.dynamic_rotate %4 by %c7_i32 dim 0 : vector<8x128xf32>, i32 -> vector<8x128xf32>
    %11 = arith.subf %10, %4 : vector<8x128xf32>
    %12 = arith.mulf %11, %11 : vector<8x128xf32>
    %c0_7 = arith.constant 0 : index
    %c0_8 = arith.constant 0 : index
    %c0_9 = arith.constant 0 : index
    %c0_10 = arith.constant 0 : index
    %13 = vector.load %arg4[%c0_7, %c0_8, %c0_9, %c0_10] : memref<1x1x8x128xf32, #tpu.memory_space<vmem>>, vector<1x1x8x128xf32>
    %14 = vector.shape_cast %13 : vector<1x1x8x128xf32> to vector<8x128xf32>
    %15 = vector.shape_cast %12 : vector<8x128xf32> to vector<1x8x128xf32>
    %cst = arith.constant dense<0.000000e+00> : vector<8x128xf32>
    %16 = vector.multi_reduction <add>, %15, %cst [0] : vector<1x8x128xf32> to vector<8x128xf32>
    %17 = arith.addf %14, %16 : vector<8x128xf32>
    %c0_11 = arith.constant 0 : index
    %c0_12 = arith.constant 0 : index
    %c0_13 = arith.constant 0 : index
    %c0_14 = arith.constant 0 : index
    %18 = vector.load %arg4[%c0_11, %c0_12, %c0_13, %c0_14] : memref<1x1x8x128xf32, #tpu.memory_space<vmem>>, vector<1x1x8x128xf32>
    %19 = vector.shape_cast %18 : vector<1x1x8x128xf32> to vector<8x128xf32>
    %20 = vector.shape_cast %17 : vector<8x128xf32> to vector<1x1x8x128xf32>
    tpu.vector_store %arg4[%c0_11, %c0_12, %c0_13, %c0_14], %20 {strides = array<i32>} : memref<1x1x8x128xf32, #tpu.memory_space<vmem>>, vector<1x1x8x128xf32>,
    %21 = vector.extract_strided_slice %4 {offsets = [0, 0], sizes = [1, 128], strides = [1, 1]} : vector<8x128xf32> to vector<1x128xf32>
    %22 = vector.extract_strided_slice %4 {offsets = [7, 0], sizes = [1, 128], strides = [1, 1]} : vector<8x128xf32> to vector<1x128xf32>
    %23 = arith.subf %21, %22 : vector<1x128xf32>
    %24 = arith.mulf %7, %7 : vector<1x128xf32>
    %25 = arith.mulf %23, %23 : vector<1x128xf32>
    %26 = arith.subf %24, %25 : vector<1x128xf32>
    %c0_15 = arith.constant 0 : index
    %c0_16 = arith.constant 0 : index
    %c0_17 = arith.constant 0 : index
    %c0_18 = arith.constant 0 : index
    %27 = vector.load %arg4[%c0_15, %c0_16, %c0_17, %c0_18] : memref<1x1x8x128xf32, #tpu.memory_space<vmem>>, vector<1x1x1x128xf32>
    %28 = vector.shape_cast %27 : vector<1x1x1x128xf32> to vector<1x128xf32>
    %29 = arith.addf %28, %26 : vector<1x128xf32>
    %c0_19 = arith.constant 0 : index
    %c0_20 = arith.constant 0 : index
    %c0_21 = arith.constant 0 : index
    %c0_22 = arith.constant 0 : index
    %30 = vector.load %arg4[%c0_19, %c0_20, %c0_21, %c0_22] : memref<1x1x8x128xf32, #tpu.memory_space<vmem>>, vector<1x1x1x128xf32>
    %31 = vector.shape_cast %30 : vector<1x1x1x128xf32> to vector<1x128xf32>
    %32 = vector.shape_cast %29 : vector<1x128xf32> to vector<1x1x1x128xf32>
    tpu.vector_store %arg4[%c0_19, %c0_20, %c0_21, %c0_22], %32 {strides = array<i32>} : memref<1x1x8x128xf32, #tpu.memory_space<vmem>>, vector<1x1x1x128xf32>,
    return
  }
  func.func @transform_0(%arg0: i32, %arg1: i32, %arg2: i32) -> (i32, i32, i32) {
    %c1_i32 = arith.constant 1 : i32
    %0 = arith.muli %arg1, %c1_i32 : i32
    %1 = arith.addi %0, %arg2 : i32
    %c0_i32 = arith.constant 0 : i32
    %c0_i32_0 = arith.constant 0 : i32
    return %arg0, %1, %c0_i32 : i32, i32, i32
  }
  func.func @transform_1(%arg0: i32, %arg1: i32, %arg2: i32) -> (i32, i32, i32, i32) {
    %c0_i32 = arith.constant 0 : i32
    %c0_i32_0 = arith.constant 0 : i32
    %c0_i32_1 = arith.constant 0 : i32
    return %arg0, %arg1, %c0_i32, %c0_i32_0 : i32, i32, i32, i32
  }
}

</mosaic_0001>

<bundles_post_ra>
// kernel: tpu_custom_call.1
= control target key start
LH: loop header
LB: loop body
LE: loop exit
PB: predicated region body
PF: predicated region fallthrough
CT: control target
= control target key end

     0   :  { %6 = vsyncpa [#allocation4], 0  ;;  %s619_s0 = inlined_call_operand.hbm [shape: f32[2,8,128], index: 0, kind: input, shape index: {}]   ;;  %s620_s1 = inlined_call_operand.hbm [shape: f32[2,1,8,128], index: 1, kind: output, shape index: {}]  }
   0x1   :  { %8 = vsyncpa [#allocation4 + $0x1], 0 }
   0x2   :  { %9 = vsyncpa [#allocation5], 0 }
   0x3   :  { %11 = vsyncpa [#allocation5 + $0x1], 0  ;;  %s485_s6 = smov 0   ;;  %s487_s7 = smov 0  }
   0x4   :  { %s489_s8 = smov 0   ;;  %s491_s9 = smov 0  }
   0x5   :  { %s493_s10 = smov 0   ;;  %s495_s11 = smov 0  }
   0x6 LB: > { %s287_s12 = sadd.s32 4294967295, %s471_s11   ;;  %s288_s13 = sadd.s32 4294967294, %s471_s11   ;;  %s471_s11 = sphi %s495_s11, %s17_s11   ;;  %s467_s10 = sphi %s493_s10, %s632_s10   ;;  %s463_s9 = sphi %s491_s9, %s631_s9   ;;  %s459_s8 = sphi %s489_s8, %s630_s8   ;;  %s455_s7 = sphi %s487_s7, %s629_s7   ;;  %s451_s6 = sphi %s485_s6, %s628_s6  }
   0x7   : > { %s36_s14 = sadd.s32 1, %s467_s10  ;;  %s47_s15 = sadd.s32 1, %s459_s8 }
   0x8   : > { %p38_p0 = scmp.ge.s32.totalorder %s36_s14, 2  ;;  %p54_p1 = scmp.ne.s32.totalorder %s459_s8, %s455_s7 }
   0x9   : > { %p55_p2 = scmp.eq.s32.totalorder %s471_s11, 0  ;;  %p60_p3 = scmp.ne.s32.totalorder %s455_s7, %s451_s6 }
   0xa   : > { %s634_s14 = smov (%p38_p0, %s36_s14), 0  ;;  %p61_p5 = scmp.eq.s32.totalorder %s287_s12, 0 }
   0xb   : > { %p526_p4 = por %p55_p2, %p54_p1  ;;  %s42_s17 = ssub.s32 %s467_s10, %s634_s14 }
   0xc   : > { %p86_p6 = scmp.eq.s32.totalorder %s287_s12, 1  ;;  %p45_p7 = scmp.eq.s32.totalorder %s42_s17, 0 }
   0xd   : > { %p532_p8 = por %p61_p5, %p60_p3  ;;  %p92_p10 = scmp.eq.s32.totalorder %s288_s13, 1 }
   0xe   : > { %p536_p9 = por %p86_p6, %p54_p1  ;;  %p312_p13 = scmp.lt.s32.totalorder %s471_s11, 2 }
   0xf   : > { %s541_s20 = scalar_select %p45_p7, %s459_s8, %s47_s15  }
  0x10   : > { %p543_p11 = por %p92_p10, %p60_p3  ;;  %s112_s22 = sand.u32 1, %s459_s8  }
  0x11   : > { %s291_s23 = sshll.u32 %s112_s22, 3  ;;  %s292_s24 = sshll.u32 %s467_s10, 7 }
  0x12   : > { %s624_s21 = scalar_select %p543_p11, 1, 0 }
  0x13   : > { %s123_s27 = scalar_lea.hbm %s619_s0, %s292_s24  ;;  %s116_s28 = scalar_lea.vmem [#allocation3], %s291_s23 }
  0x14   : > { %s125_s29 = sshll.u32 %s116_s28, 4  ;;  %p556_p0 = pnand %p312_p13, %p526_p4  ;;  %s126_s29 = int_to_ptr.vmem [resolvable:$true] %s125_s29 }
  0x15   : > { %p293_p1 = scmp.ge.s32.totalorder %s471_s11, 1  ;;  %p130_p2 = scmp.lt.s32.totalorder %s471_s11, 3 }
  0x16   : > { %s113_s2 = scalar_lea.sflag [#allocation4], %s112_s22  ;;  %p365_p3 = pneg %p556_p0 }
  0x17   : > { %s376_s3 = scalar_lea.vmem %s126_s29, 128  ;;  %s473_s4 = smov [#allocation3]  }
  0x18   : > { %p377_p5 = scmp.ne.s32.totalorder %s126_s29, %s376_s3  ;;  %s381_s5 = sshll.u32 %s473_s4, 4  ;;  %s382_s5 = int_to_ptr.vmem [resolvable:$false] %s381_s5 }
  0x19   : > { %s383_s12 = scalar_lea.vmem %s382_s5, 256  ;;  %p384_p10 = scmp.lt.s32.totalorder %s126_s29, %s382_s5 }
  0x1a   : > { %p379_p6 = pnand %p377_p5, %p365_p3  ;;  %p385_p12 = scmp.lt.s32.totalorder %s383_s12, %s376_s3 }
  0x1c   : > { %p380_p7 = pneg %p379_p6  ;;  %p386_p4 = por %p385_p12, %p384_p10 }
  0x1e   : > { %p387_p13 = pnand %p386_p4, %p380_p7 }
  0x20   : > { %390 = shalt.err (!%p387_p13)
}
  0x21   : > { %307 = dma.hbm_to_vmem [thread:$0]  (!%p556_p0), %s123_s27, 128, %s126_s29, %s113_s2  }
  0x22   : > { %p131_p11 = pnand %p293_p1, %p130_p2 }
  0x23   : > { %s571_s13 = sand.u32 (!%p131_p11), 1, %s455_s7  }
  0x24   : > { %134 = sbr.rel (%p131_p11) target bundleno = 73 (0x49), region = 24  ;;  %s294_s15 = sshll.u32 (!%p131_p11), %s571_s13, 3 }
  0x25   : > { %s137_s16 = scalar_lea.sflag (!%p131_p11), [#allocation4], %s571_s13  ;;  %s140_s17 = scalar_lea.vmem (!%p131_p11), [#allocation3], %s294_s15 }
  0x29   : > { %442 = dma.done.wait (%p532_p8), %s137_s16, 128  }
  0x2a   : > { %444 = vsyncadd (%p532_p8), %s137_s16, 4294967168  ;;  %v165_v0 = vld [vmem:[%s140_s17] sm:$0x1]  ;;  %s158_s22 = scalar_lea.vmem [#allocation6], %s294_s15  ;;  %s297_s18 = sshll.u32 %s463_s9, 7 }
  0x2b   : > { %v167_v1 = vld [vmem:[%s140_s17] sm:$0xff]  ;;  %166 = vst [vmem:[#allocation2] sm:$0x1] %v165_v0  ;;  %s203_s23 = sshll.u32 %s158_s22, 4  ;;  %s201_s26 = scalar_lea.hbm %s620_s1, %s297_s18  ;;  %s204_s23 = int_to_ptr.vmem [resolvable:$true] %s203_s23 }
  0x2c   : > { %v171_v2 = vrot.slane %v167_v1, 1  ;;  %v179_v3 = vrot.slane %v167_v1, 7  ;;  %s189_s27 = scalar_lea.sflag [#allocation5], %s571_s13  ;;  %s391_s28 = scalar_lea.vmem %s204_s23, 128 }
  0x2d   : > { %p392_p8 = scmp.ne.s32.totalorder %s204_s23, %s391_s28  ;;  %s474_s29 = smov [#allocation6]  }
  0x2e   : > { %v172_v4 = vsub.f32 %v171_v2, %v167_v1  ;;  %v181_v6 = vsub.f32 %v167_v1, %v179_v3  ;;  %s395_s30 = sshll.u32 %s474_s29, 4  ;;  %s396_s30 = int_to_ptr.vmem [resolvable:$false] %s395_s30 }
  0x2f   : > { %p393_p11 = pnand %p392_p8, %p536_p9  ;;  %s397_s2 = scalar_lea.vmem %s396_s30, 256 }
  0x30   : > { %v173_v5 = vmul.f32 %v172_v4, %v172_v4  ;;  %v183_v9 = vmul.f32 %v181_v6, %v181_v6  ;;  %p398_p0 = scmp.lt.s32.totalorder %s204_s23, %s396_s30  ;;  %p399_p1 = scmp.lt.s32.totalorder %s397_s2, %s391_s28 }
  0x31   : > { %p394_p12 = pneg %p393_p11 }
  0x32   : > { %v168_v7 = vld [vmem:[#allocation2] sm:$0x1]  ;;  %177 = vst [vmem:[%s158_s22] sm:$0xff] %v173_v5  ;;  %p400_p2 = por %p399_p1, %p398_p0 }
  0x33   : > { %v169_v8 = vsub.f32 %v167_v1, %v168_v7  ;;  %170 = vst [vmem:[#allocation2 - $0x7] sm:$0x80] %v167_v1 }
  0x34   : > { %p401_p3 = pnand %p400_p2, %p394_p12 }
  0x35   : > { %v182_v10 = vmul.f32 %v169_v8, %v169_v8 }
  0x37   : > { %v184_v11 = vsub.f32 %v182_v10, %v183_v9 }
  0x39   : > { %v185_v12 = vld [vmem:[%s158_s22] sm:$0x1] }
  0x3a   : > { %v186_v13 = vadd.f32 %v185_v12, %v184_v11 }
  0x3c   : > { %187 = vst [vmem:[%s158_s22] sm:$0x1] %v186_v13 }
  0x3d   : > { %404 = shalt.err (!%p401_p3)
}
  0x3e   : > { %s405_s9 = scalar_lea.hbm %s201_s26, 128  ;;  %s409_s5 = scalar_lea.hbm %s620_s1, 256 }
  0x3f   : > { %p406_p5 = scmp.ne.s32.totalorder %s201_s26, %s405_s9  ;;  %p410_p10 = scmp.lt.s32.totalorder %s201_s26, %s620_s1 }
  0x40   : > { %p411_p4 = scmp.lt.s32.totalorder %s409_s5, %s405_s9 }
  0x41   : > { %p407_p6 = pnand %p406_p5, %p536_p9 }
  0x42   : > { %p412_p13 = por %p411_p4, %p410_p10 }
  0x43   : > { %p408_p7 = pneg %p407_p6 }
  0x45   : > { %p413_p8 = pnand %p412_p13, %p408_p7 }
  0x47   : > { %416 = shalt.err (!%p413_p8)
}
  0x48   : > { %302 = dma.vmem_to_hbm [thread:$0]  (%p536_p9), %s204_s23, 128, %s201_s26, %s189_s27  }
  0x49 PF: > { %s215_s15 = sand.u32 1, %s451_s6   ;;  %p626_p11 = scmp.ne.s32.totalorder %s624_s21, 0 }
  0x4a   : > { %p627_p12 = scmp.ge.s32.totalorder %s471_s11, 2  ;;  %s216_s16 = scalar_lea.sflag [#allocation5], %s215_s15 }
  0x4c   : > { %p309_p0 = pnand %p627_p12, %p626_p11 }
  0x4e   : > { %p310_p1 = pneg %p309_p0 }
  0x50   : > { %446 = dma.done.wait (%p310_p1), %s216_s16, 128  }
  0x51   : > { %448 = vsyncadd (%p310_p1), %s216_s16, 4294967168  ;;  %s17_s11 = sadd.s32 1, %s471_s11   ;;  %s628_s6 = smov %s455_s7 }
  0x52   : > { %p14_p2 = scmp.ge.s32.totalorder %s17_s11, 4   ;;  %s629_s7 = smov %s459_s8 }
  0x53   : > { %s630_s8 = smov %s541_s20  ;;  %s631_s9 = smov %s467_s10 }
  0x54   : > { %s632_s10 = smov %s634_s14  ;;  %16 = sbr.rel (!%p14_p2) target bundleno = 6 (0x6), region = 73 }
  0x59   :  { %221 = vsyncpa [#allocation4], 1 }
  0x5a   :  { %223 = vsyncpa [#allocation4 + $0x1], 1 }
  0x5b   :  { %224 = vsyncpa [#allocation5], 1 }
  0x5c   :  { %226 = vsyncpa [#allocation5 + $0x1], 1 }

</bundles_post_ra>
